<compile_context>
chip_gen: v6e
topology: v6e:2x2x1
jax: 0.10.0
libtpu: 0.0.40
codegen_flags: <defaults>
</compile_context>

<pallas_src>
import functools

import jax
import jax.numpy as jnp
from jax import lax
from jax.experimental import pallas as pl
from jax.experimental.pallas import tpu as pltpu


# ---------------------------------------------------------------------------
# Config (mirrors cfgs.p / cfgs.eps in the PyTorch module's __init__)
# ---------------------------------------------------------------------------
GEM_P_INIT = 3.0        # nn.Parameter(torch.ones(1) * p)
GEM_EPS = 1e-6          # self.eps

_LANE = 128
_ROW_TILE_MAX = 256                     # rows per block in the large-N path
_BLOCK_TARGET_BYTES = 4 * 1024 * 1024   # per-input-block budget (2-4 MiB sweet spot)


def _round_up(v, m):
    return ((v + m - 1) // m) * m


def _round_down(v, m):
    return (v // m) * m


def _vmem_limit_bytes():
    """Generation-aware scoped-VMEM limit (v7x: 64 MiB/TC; v5e/v6e: 128 MiB)."""
    try:
        cap = int(pltpu.get_tpu_info().vmem_capacity_bytes)
    except Exception:               # unknown chip / mock: assume the smallest (v7x)
        cap = 64 * 1024 * 1024
    return min(max(cap // 2, 32 * 1024 * 1024), 64 * 1024 * 1024)


# ---------------------------------------------------------------------------
# In-kernel helpers
# ---------------------------------------------------------------------------
def _static_pow(x, p):
    """Trace-time-specialized x**p (VPU-only for small integer p)."""
    if p == 1.0:
        return x
    if p == 2.0:
        return x * x
    if p == 3.0:
        return x * x * x
    if p == 4.0:
        x2 = x * x
        return x2 * x2
    return jnp.exp(p * jnp.log(x))


def _pow_dispatch(x, p, consume, static_p):
    """Call consume(x**p) exactly once; integer fast paths stay on the VPU."""
    if static_p is not None:
        consume(_static_pow(x, static_p))
        return

    is2 = p == 2.0
    is3 = p == 3.0
    is4 = p == 4.0

    @pl.when(is3)
    def _():                                       # module init value (p = 3)
        consume(x * x * x)

    @pl.when(is2)
    def _():
        consume(x * x)

    @pl.when(is4)
    def _():
        x2 = x * x
        consume(x2 * x2)

    @pl.when(jnp.logical_not(jnp.logical_or(is2, jnp.logical_or(is3, is4))))
    def _():                                       # general exponent: EUP path
        consume(jnp.exp(p * jnp.log(x)))


def _p_root(m, p, static_p):
    """m ** (1/p) on strictly-positive m."""
    if static_p is not None:
        if static_p == 1.0:
            return m
        if static_p == 2.0:
            return jnp.sqrt(m)
        return jnp.exp(jnp.log(m) * (1.0 / static_p))
    return jnp.exp(jnp.log(m) / p)


def _lane_partial_sum(xp, n_tile):
    """(rows, n_tile) -> (rows, 128) per-lane partial sums; pure lane-aligned VPU adds."""
    s = xp[:, 0:_LANE]
    for j in range(1, n_tile // _LANE):
        s = s + xp[:, j * _LANE:(j + 1) * _LANE]
    return s


# ---------------------------------------------------------------------------
# Kernels
# ---------------------------------------------------------------------------
def _gem_rowpass_kernel(p_ref, x_ref, o_ref, *, n_total, static_p):
    """Full-N single pass: one (row_tile, N) block per grid step, no accumulator."""
    p = p_ref[0]
    x = jnp.maximum(x_ref[...].astype(jnp.float32), GEM_EPS)     # clamp(min=eps)
    inv_n = 1.0 / n_total

    def finish(xp):
        m = jnp.sum(xp, axis=-1, keepdims=True) * inv_n          # mean via static 1/N
        o_ref[...] = _p_root(m, p, static_p).astype(o_ref.dtype)

    _pow_dispatch(x, p, finish, static_p)


def _gem_tiled_kernel(p_ref, x_ref, o_ref, acc_ref, *,
                      n_total, n_tile, mask_cols, static_p):
    """Large-N path: grid = (row tiles, N tiles); lane-dense (row_tile, 128) acc."""
    k = pl.program_id(1)
    last_k = pl.num_programs(1) - 1
    p = p_ref[0]

    @pl.when(k == 0)
    def _init():
        acc_ref[...] = jnp.zeros_like(acc_ref)

    def accumulate(masked):
        x = jnp.maximum(x_ref[...].astype(jnp.float32), GEM_EPS)
        if masked:
            # Fill padded tail lanes with 1.0 (1**p == 1 for every p); the exact
            # pad contribution is a compile-time constant subtracted at finalize.
            col = lax.broadcasted_iota(jnp.int32, x.shape, 1)
            x = jnp.where(col < (n_total - k * n_tile), x, 1.0)

        def add(xp):
            acc_ref[...] += _lane_partial_sum(xp, n_tile)        # pure VPU adds

        _pow_dispatch(x, p, add, static_p)

    if mask_cols:
        @pl.when(k < last_k)
        def _():                     # interior tiles: zero mask work
            accumulate(masked=False)

        @pl.when(k == last_k)
        def _():                     # only the ragged tail tile pays for the mask
            accumulate(masked=True)
    else:
        accumulate(masked=False)

    @pl.when(k == last_k)
    def _finalize():
        s = jnp.sum(acc_ref[...], axis=-1, keepdims=True)        # single 128->1 reduce
        if mask_cols:
            num_k = (n_total + n_tile - 1) // n_tile
            s = s - float(num_k * n_tile - n_total)              # remove pad (=1.0 each)
        m = s * (1.0 / n_total)
        o_ref[...] = _p_root(m, p, static_p).astype(o_ref.dtype)


# ---------------------------------------------------------------------------
# Wrapper
# ---------------------------------------------------------------------------
def gem_forward(x, p, *, _force_gridded=False, _n_tile=None, _row_tile=None):
    """GeM forward.

    x : (B, C, N) or (B, C, H, W, ...) array.
    p : learnable exponent — either a JAX array (shape (1,) or scalar, runtime
        dispatch) or a Python float/int (trace-time-specialized kernel).
    Returns a (B, C) array with the same dtype as x.
    """
    B, C = x.shape[0], x.shape[1]
    x2d = x.reshape(B * C, -1)                     # (R, N)
    R, N = x2d.shape
    out_dtype = x.dtype

    if isinstance(p, (int, float)):
        static_p = float(p)
        p_arr = jnp.full((1,), static_p, dtype=jnp.float32)
    else:
        static_p = None
        p_arr = jnp.asarray(p).reshape((1,)).astype(jnp.float32)

    vmem_limit = _vmem_limit_bytes()
    block_target = min(_BLOCK_TARGET_BYTES, vmem_limit // 8)
    itemsize = 4   # budget in f32 terms (covers in-kernel f32 temporaries)

    # Advisory cost estimate (assume the integer-p VPU path for dynamic p — the
    # module's init value is 3 — so XLA is not told about phantom EUP work).
    int_p = static_p is None or static_p in (1.0, 2.0, 3.0, 4.0)
    transcendentals = 2 * R if int_p else 2 * R * (N + 1)
    cost = pl.CostEstimate(
        flops=5 * R * N,
        transcendentals=transcendentals,
        bytes_accessed=R * N * x2d.dtype.itemsize + R * jnp.dtype(out_dtype).itemsize + 4,
    )

    max_rows_full_n = block_target // (N * itemsize)
    use_rowpass = (not _force_gridded) and (max_rows_full_n >= min(R, 8))

    if use_rowpass:
        # ---- full-N single pass: 1-D grid over row tiles only -------------
        if max_rows_full_n >= R:
            row_tile = R
        else:
            row_tile = max(8, _round_down(max_rows_full_n, 8))
        if _row_tile is not None:
            row_tile = _row_tile
        # v7x megacore: make sure the "parallel" row axis has >= 2 blocks.
        if pl.cdiv(R, row_tile) == 1 and R >= 16:
            row_tile = min(row_tile, _round_up(pl.cdiv(R, 2), 8))

        grid = (pl.cdiv(R, row_tile),)
        kernel = functools.partial(_gem_rowpass_kernel, n_total=N, static_p=static_p)
        out2d = pl.pallas_call(
            kernel,
            out_shape=jax.ShapeDtypeStruct((R, 1), out_dtype),
            grid=grid,
            in_specs=[
                pl.BlockSpec((1,), lambda i: (0,),
                             memory_space=pltpu.MemorySpace.SMEM),      # p
                pl.BlockSpec((row_tile, N), lambda i: (i, 0)),          # x rows
            ],
            out_specs=pl.BlockSpec((row_tile, 1), lambda i: (i, 0)),
            compiler_params=pltpu.CompilerParams(
                dimension_semantics=("parallel",),
                vmem_limit_bytes=vmem_limit),
            cost_estimate=cost,
        )(p_arr, x2d)
    else:
        # ---- large-N path: 2-D grid (row tiles x N tiles) ------------------
        row_tile = min(R, _ROW_TILE_MAX) if _row_tile is None else _row_tile
        if row_tile < R:
            row_tile = max(8, _round_down(row_tile, 8))
        if pl.cdiv(R, row_tile) == 1 and R >= 16:
            row_tile = min(row_tile, _round_up(pl.cdiv(R, 2), 8))

        if _n_tile is not None:
            n_tile = _n_tile
        else:
            n_tile = max(_LANE, _round_down(block_target // (row_tile * itemsize), _LANE))
            n_tile = min(n_tile, max(_LANE, _round_down(N, _LANE)))
        assert n_tile % _LANE == 0, "n_tile must be a multiple of 128"
        mask_cols = (N % n_tile) != 0

        grid = (pl.cdiv(R, row_tile), pl.cdiv(N, n_tile))
        kernel = functools.partial(_gem_tiled_kernel, n_total=N, n_tile=n_tile,
                                   mask_cols=mask_cols, static_p=static_p)
        out2d = pl.pallas_call(
            kernel,
            out_shape=jax.ShapeDtypeStruct((R, 1), out_dtype),
            grid=grid,
            in_specs=[
                pl.BlockSpec((1,), lambda i, k: (0,),
                             memory_space=pltpu.MemorySpace.SMEM),      # p
                pl.BlockSpec((row_tile, n_tile), lambda i, k: (i, k)),  # x tile
            ],
            out_specs=pl.BlockSpec((row_tile, 1), lambda i, k: (i, 0)),
            scratch_shapes=[pltpu.VMEM((row_tile, _LANE), jnp.float32)],
            compiler_params=pltpu.CompilerParams(
                dimension_semantics=("parallel", "arbitrary"),
                vmem_limit_bytes=vmem_limit),
            cost_estimate=cost,
        )(p_arr, x2d)

    return out2d.reshape(B, C)


# ---------------------------------------------------------------------------
# Plain-JAX reference (matches the PyTorch forward)
# ---------------------------------------------------------------------------
def gem_reference(x, p):
    B, C = x.shape[0], x.shape[1]
    pv = jnp.asarray(p, dtype=jnp.float32).reshape(())
    xf = x.reshape(B, C, -1).astype(jnp.float32)
    xp = jnp.power(jnp.maximum(xf, GEM_EPS), pv)
    m = jnp.mean(xp, axis=-1)
    return jnp.power(m, 1.0 / pv).astype(x.dtype)


# ---------------------------------------------------------------------------
# Self-test
# ---------------------------------------------------------------------------
def _check(x, p, atol=1e-5, rtol=2e-4, **kw):
    p_arr = jnp.asarray(p, dtype=jnp.float32).reshape((1,))
    out = jax.block_until_ready(gem_forward(x, p, **kw))
    ref = gem_reference(x, p_arr)
    assert out.shape == (x.shape[0], x.shape[1]), f"bad output shape {out.shape}"
    assert jnp.allclose(out, ref, atol=atol, rtol=rtol), (
        f"mismatch (p={p}, shape={x.shape}): "
        f"max abs err {float(jnp.max(jnp.abs(out - ref)))}"
    )


if __name__ == "__main__":
    key = jax.random.PRNGKey(0)
    k1, k2, k3 = jax.random.split(key, 3)

    # 1) Small image-style input (full-N single-pass path), learnable-p array.
    x_small = jax.random.normal(k1, (2, 4, 16, 16), dtype=jnp.float32)
    _check(x_small, jnp.ones((1,), jnp.float32) * GEM_P_INIT)   # runtime p=3 (VPU path)
    _check(x_small, jnp.ones((1,), jnp.float32) * 2.5)          # runtime general exponent
    _check(x_small, 3.0)                                        # trace-time-specialized p

    # 2) Larger input: full-N single pass with >=2 row blocks (v7x megacore split).
    x_mid = jax.random.normal(k2, (2, 192, 37, 37), dtype=jnp.float32)
    _check(x_mid, jnp.ones((1,), jnp.float32) * GEM_P_INIT)
    _check(x_mid, 4.0)                                          # static integer fast path

    # 3) Exercise the large-N gridded path (forced small tiles): ragged-tail mask
    #    gated to the last N tile, lane-dense accumulator, init/finalize pl.when.
    x_grid = jax.random.normal(k3, (2, 64, 37, 37), dtype=jnp.float32)
    _check(x_grid, jnp.ones((1,), jnp.float32) * GEM_P_INIT,
           _force_gridded=True, _n_tile=512)
    _check(x_grid, 2.5, _force_gridded=True, _n_tile=512)

    print("KERNEL_OK")
</pallas_src>

<mosaic_0001>
module attributes {stable_mosaic.version = 11 : i64} {
  func.func @_gem_rowpass_kernel(%arg0: i32, %arg1: memref<1xf32, #tpu.memory_space<smem>>, %arg2: memref<8x256xf32, #tpu.memory_space<vmem>>, %arg3: memref<8x1xf32, #tpu.memory_space<vmem>>) attributes {dimension_semantics = [#tpu.dimension_semantics<parallel>], iteration_bounds = array<i64: 1>, scalar_prefetch = 0 : i64, scratch_operands = 0 : i64, tpu.core_type = #tpu.core_type<tc>, window_params = [{transform_indices = @transform_0, window_bounds = array<i64: 1>}, {transform_indices = @transform_1, window_bounds = array<i64: 8, 256>}, {transform_indices = @transform_2, window_bounds = array<i64: 8, 1>}]} {
    %c0 = arith.constant 0 : index
    %0 = memref.load %arg1[%c0] : memref<1xf32, #tpu.memory_space<smem>>
    %c0_0 = arith.constant 0 : index
    %c0_1 = arith.constant 0 : index
    %1 = vector.load %arg2[%c0_0, %c0_1] : memref<8x256xf32, #tpu.memory_space<vmem>>, vector<8x256xf32>
    %cst = arith.constant 9.99999997E-7 : f32
    %2 = vector.broadcast %cst : f32 to vector<8x256xf32>
    %3 = arith.maximumf %1, %2 : vector<8x256xf32>
    %cst_2 = arith.constant 2.000000e+00 : f32
    %4 = arith.cmpf oeq, %0, %cst_2 : f32
    %cst_3 = arith.constant 3.000000e+00 : f32
    %5 = arith.cmpf oeq, %0, %cst_3 : f32
    %cst_4 = arith.constant 4.000000e+00 : f32
    %6 = arith.cmpf oeq, %0, %cst_4 : f32
    %7 = arith.extui %5 : i1 to i32
    %c0_i32 = arith.constant 0 : i32
    %8 = arith.cmpi ne, %7, %c0_i32 : i32
    scf.if %8 {
      %18 = arith.mulf %3, %3 : vector<8x256xf32>
      %19 = arith.mulf %18, %3 : vector<8x256xf32>
      %cst_8 = arith.constant dense<0.000000e+00> : vector<8xf32>
      %20 = vector.multi_reduction <add>, %19, %cst_8 [1] : vector<8x256xf32> to vector<8xf32>
      %21 = vector.shape_cast %20 : vector<8xf32> to vector<8x1xf32>
      %cst_9 = arith.constant 3.906250e-03 : f32
      %22 = vector.broadcast %cst_9 : f32 to vector<8x1xf32>
      %23 = arith.mulf %21, %22 : vector<8x1xf32>
      %24 = math.log %23 : vector<8x1xf32>
      %25 = vector.broadcast %0 : f32 to vector<8x1xf32>
      %26 = arith.divf %24, %25 : vector<8x1xf32>
      %27 = math.exp %26 : vector<8x1xf32>
      %c0_10 = arith.constant 0 : index
      %c0_11 = arith.constant 0 : index
      %28 = vector.load %arg3[%c0_10, %c0_11] : memref<8x1xf32, #tpu.memory_space<vmem>>, vector<8x1xf32>
      tpu.vector_store %arg3[%c0_10, %c0_11], %27 {strides = array<i32>} : memref<8x1xf32, #tpu.memory_space<vmem>>, vector<8x1xf32>,
    } else {
    }
    %9 = arith.extui %4 : i1 to i32
    %c0_i32_5 = arith.constant 0 : i32
    %10 = arith.cmpi ne, %9, %c0_i32_5 : i32
    scf.if %10 {
      %18 = arith.mulf %3, %3 : vector<8x256xf32>
      %cst_8 = arith.constant dense<0.000000e+00> : vector<8xf32>
      %19 = vector.multi_reduction <add>, %18, %cst_8 [1] : vector<8x256xf32> to vector<8xf32>
      %20 = vector.shape_cast %19 : vector<8xf32> to vector<8x1xf32>
      %cst_9 = arith.constant 3.906250e-03 : f32
      %21 = vector.broadcast %cst_9 : f32 to vector<8x1xf32>
      %22 = arith.mulf %20, %21 : vector<8x1xf32>
      %23 = math.log %22 : vector<8x1xf32>
      %24 = vector.broadcast %0 : f32 to vector<8x1xf32>
      %25 = arith.divf %23, %24 : vector<8x1xf32>
      %26 = math.exp %25 : vector<8x1xf32>
      %c0_10 = arith.constant 0 : index
      %c0_11 = arith.constant 0 : index
      %27 = vector.load %arg3[%c0_10, %c0_11] : memref<8x1xf32, #tpu.memory_space<vmem>>, vector<8x1xf32>
      tpu.vector_store %arg3[%c0_10, %c0_11], %26 {strides = array<i32>} : memref<8x1xf32, #tpu.memory_space<vmem>>, vector<8x1xf32>,
    } else {
    }
    %11 = arith.extui %6 : i1 to i32
    %c0_i32_6 = arith.constant 0 : i32
    %12 = arith.cmpi ne, %11, %c0_i32_6 : i32
    scf.if %12 {
      %18 = arith.mulf %3, %3 : vector<8x256xf32>
      %19 = arith.mulf %18, %18 : vector<8x256xf32>
      %cst_8 = arith.constant dense<0.000000e+00> : vector<8xf32>
      %20 = vector.multi_reduction <add>, %19, %cst_8 [1] : vector<8x256xf32> to vector<8xf32>
      %21 = vector.shape_cast %20 : vector<8xf32> to vector<8x1xf32>
      %cst_9 = arith.constant 3.906250e-03 : f32
      %22 = vector.broadcast %cst_9 : f32 to vector<8x1xf32>
      %23 = arith.mulf %21, %22 : vector<8x1xf32>
      %24 = math.log %23 : vector<8x1xf32>
      %25 = vector.broadcast %0 : f32 to vector<8x1xf32>
      %26 = arith.divf %24, %25 : vector<8x1xf32>
      %27 = math.exp %26 : vector<8x1xf32>
      %c0_10 = arith.constant 0 : index
      %c0_11 = arith.constant 0 : index
      %28 = vector.load %arg3[%c0_10, %c0_11] : memref<8x1xf32, #tpu.memory_space<vmem>>, vector<8x1xf32>
      tpu.vector_store %arg3[%c0_10, %c0_11], %27 {strides = array<i32>} : memref<8x1xf32, #tpu.memory_space<vmem>>, vector<8x1xf32>,
    } else {
    }
    %13 = arith.ori %5, %6 : i1
    %14 = arith.ori %4, %13 : i1
    %true = arith.constant true
    %15 = arith.xori %14, %true : i1
    %16 = arith.extui %15 : i1 to i32
    %c0_i32_7 = arith.constant 0 : i32
    %17 = arith.cmpi ne, %16, %c0_i32_7 : i32
    scf.if %17 {
      %18 = math.log %3 : vector<8x256xf32>
      %19 = vector.broadcast %0 : f32 to vector<8x256xf32>
      %20 = arith.mulf %19, %18 : vector<8x256xf32>
      %21 = math.exp %20 : vector<8x256xf32>
      %cst_8 = arith.constant dense<0.000000e+00> : vector<8xf32>
      %22 = vector.multi_reduction <add>, %21, %cst_8 [1] : vector<8x256xf32> to vector<8xf32>
      %23 = vector.shape_cast %22 : vector<8xf32> to vector<8x1xf32>
      %cst_9 = arith.constant 3.906250e-03 : f32
      %24 = vector.broadcast %cst_9 : f32 to vector<8x1xf32>
      %25 = arith.mulf %23, %24 : vector<8x1xf32>
      %26 = math.log %25 : vector<8x1xf32>
      %27 = vector.broadcast %0 : f32 to vector<8x1xf32>
      %28 = arith.divf %26, %27 : vector<8x1xf32>
      %29 = math.exp %28 : vector<8x1xf32>
      %c0_10 = arith.constant 0 : index
      %c0_11 = arith.constant 0 : index
      %30 = vector.load %arg3[%c0_10, %c0_11] : memref<8x1xf32, #tpu.memory_space<vmem>>, vector<8x1xf32>
      tpu.vector_store %arg3[%c0_10, %c0_11], %29 {strides = array<i32>} : memref<8x1xf32, #tpu.memory_space<vmem>>, vector<8x1xf32>,
    } else {
    }
    return
  }
  func.func @transform_0(%arg0: i32) -> i32 {
    %c0_i32 = arith.constant 0 : i32
    %c0_i32_0 = arith.constant 0 : i32
    return %c0_i32 : i32
  }
  func.func @transform_1(%arg0: i32) -> (i32, i32) {
    %c0_i32 = arith.constant 0 : i32
    %c0_i32_0 = arith.constant 0 : i32
    return %arg0, %c0_i32 : i32, i32
  }
  func.func @transform_2(%arg0: i32) -> (i32, i32) {
    %c0_i32 = arith.constant 0 : i32
    %c0_i32_0 = arith.constant 0 : i32
    return %arg0, %c0_i32 : i32, i32
  }
}

</mosaic_0001>

<bundles_post_ra>
// kernel: tpu_custom_call.1
= control target key start
LH: loop header
LB: loop body
LE: loop exit
PB: predicated region body
PF: predicated region fallthrough
CT: control target
= control target key end

     0   :  { %8 = vsyncpa [#allocation4], 0  ;;  %s178_s9 = smov [#allocation3]   ;;  %s274_s0 = inlined_call_operand.<no memory space> [shape: f32[1], index: 0, kind: input, shape index: {}]   ;;  %s275_s1 = inlined_call_operand.hbm [shape: f32[8,256], index: 1, kind: input, shape index: {}]   ;;  %s276_s2 = inlined_call_operand.vmem [shape: f32[8,1], index: 2, kind: output, shape index: {}]  }
   0x1   :  { %s17_s10 = sshll.u32 %s178_s9, 4  ;;  %s18_s10 = int_to_ptr.vmem [resolvable:$true] %s17_s10 }
   0x2   :  { %s164_s11 = scalar_lea.vmem %s18_s10, 256  ;;  %p169_p1 = scmp.lt.s32.totalorder %s18_s10, %s18_s10 }
   0x3   :  { %p165_p0 = scmp.ne.s32.totalorder %s18_s10, %s164_s11  ;;  %p170_p2 = scmp.lt.s32.totalorder %s164_s11, %s164_s11 }
   0x5   :  { %p171_p3 = por %p170_p2, %p169_p1 }
   0x7   :  { %p172_p4 = pnand %p171_p3, %p165_p0 }
   0x9   :  { %175 = shalt.err (!%p172_p4)
}
   0xa   :  { %20 = dma.hbm_to_vmem [thread:$0]  %s275_s1, 256, %s18_s10, [#allocation4]  }
   0xb   :  { %176 = dma.done.wait [#allocation4], 256  }
   0xc   :  { %177 = vsyncadd [#allocation4], 4294967040  ;;  %p29_p5 = scmp.eq.f32.partialorder %s274_s0, 2.0  ;;  %p30_p6 = scmp.eq.f32.partialorder %s274_s0, 3.0  ;;  %v25_v0 = vld [vmem:[#allocation3] sm:$0xff]  ;;  %v26_v1 = vld [vmem:[#allocation3 + $0x8] sm:$0xff] }
   0xd   :  { %p31_p7 = scmp.eq.f32.partialorder %s274_s0, 4.0  ;;  %v206_v2 = vmax.f32 %v25_v0, 1e-06  ;;  %v208_v3 = vmax.f32 %v26_v1, 1e-06  ;;  %v45_v9 = vstv (%p30_p6), %s274_s0  ;;  %vm50_vm0 = vcmask (%p30_p6), 7168  }
   0xe   :  { %34 = sbr.rel (!%p30_p6) target bundleno = 196 (0xc4), region = 17  ;;  %124 = vrcp.f32 (%p30_p6), %v45_v9 }
   0xf   :  { %v35_v4 = vmul.f32 (%p30_p6), %v206_v2, %v206_v2  ;;  %v36_v5 = vmul.f32 (%p30_p6), %v208_v3, %v208_v3 }
  0x11   :  { %v37_v6 = vmul.f32 (%p30_p6), %v35_v4, %v206_v2  ;;  %v38_v7 = vmul.f32 (%p30_p6), %v36_v5, %v208_v3 }
  0x13   :  { %v39_v8 = vadd.f32 %v38_v7, %v37_v6 }
  0x15   :  { %40 = vadd.xlane.f32.xlu0 %v39_v8 }
  0x1b   :  { %v125_v12 = vpop.eup %124 }
  0x9e   :  { %v41_v10 = vpop.xlane.xlu0 %40 }
  0x9f   :  { %v42_v11 = vmul.f32 0.00390625, %v41_v10 }
  0xa1   :  { %126 = vlog2.f32 %v42_v11 }
  0xae   :  { %v127_v13 = vpop.eup %126 }
  0xaf   :  { %v44_v14 = vmul.f32 0.6931472, %v127_v13 }
  0xb1   :  { %v47_v15 = vmul.f32 %v125_v12, %v44_v14 }
  0xb3   :  { %v48_v16 = vmul.f32 1.442695, %v47_v15 }
  0xb5   :  { %128 = vpow2.f32 %v48_v16 }
  0xc2   :  { %v129_v17 = vpop.eup %128 }
  0xc3   :  { %51 = vst.msk [vmem:[%s276_s2] sm:$0xff] %vm50_vm0, %v129_v17 }
  0xc4 PF:  { %54 = sbr.rel (!%p29_p5) target bundleno = 375 (0x177), region = 21  ;;  %v55_v18 = vmul.f32 (%p29_p5), %v206_v2, %v206_v2  ;;  %v56_v19 = vmul.f32 (%p29_p5), %v208_v3, %v208_v3  ;;  %v63_v21 = vstv (%p29_p5), %s274_s0  ;;  %vm68_vm1 = vcmask (%p29_p5), 7168  }
  0xc5   :  { %130 = vrcp.f32 (%p29_p5), %v63_v21 }
  0xc6   :  { %v57_v20 = vadd.f32 (%p29_p5), %v56_v19, %v55_v18 }
  0xc8   :  { %58 = vadd.xlane.f32.xlu0 (%p29_p5), %v57_v20 }
  0xd2   :  { %v131_v24 = vpop.eup %130 }
 0x151   :  { %v59_v22 = vpop.xlane.xlu0 %58 }
 0x152   :  { %v60_v23 = vmul.f32 0.00390625, %v59_v22 }
 0x154   :  { %132 = vlog2.f32 %v60_v23 }
 0x161   :  { %v133_v25 = vpop.eup %132 }
 0x162   :  { %v62_v26 = vmul.f32 0.6931472, %v133_v25 }
 0x164   :  { %v65_v27 = vmul.f32 %v131_v24, %v62_v26 }
 0x166   :  { %v66_v28 = vmul.f32 1.442695, %v65_v27 }
 0x168   :  { %134 = vpow2.f32 %v66_v28 }
 0x175   :  { %v135_v29 = vpop.eup %134 }
 0x176   :  { %69 = vst.msk [vmem:[%s276_s2] sm:$0xff] %vm68_vm1, %v135_v29 }
 0x177 PF:  { %72 = sbr.rel (!%p31_p7) target bundleno = 556 (0x22c), region = 25  ;;  %v73_v30 = vmul.f32 (%p31_p7), %v206_v2, %v206_v2  ;;  %v74_v31 = vmul.f32 (%p31_p7), %v208_v3, %v208_v3  ;;  %v83_v35 = vstv (%p31_p7), %s274_s0  ;;  %vm88_vm2 = vcmask (%p31_p7), 7168  }
 0x178   :  { %136 = vrcp.f32 (%p31_p7), %v83_v35 }
 0x179   :  { %v75_v32 = vmul.f32 (%p31_p7), %v73_v30, %v73_v30  ;;  %v76_v33 = vmul.f32 (%p31_p7), %v74_v31, %v74_v31 }
 0x17b   :  { %v77_v34 = vadd.f32 (%p31_p7), %v76_v33, %v75_v32 }
 0x17d   :  { %78 = vadd.xlane.f32.xlu0 %v77_v34 }
 0x185   :  { %v137_v38 = vpop.eup %136 }
 0x206   :  { %v79_v36 = vpop.xlane.xlu0 %78 }
 0x207   :  { %v80_v37 = vmul.f32 0.00390625, %v79_v36 }
 0x209   :  { %138 = vlog2.f32 %v80_v37 }
 0x216   :  { %v139_v39 = vpop.eup %138 }
 0x217   :  { %v82_v40 = vmul.f32 0.6931472, %v139_v39 }
 0x219   :  { %v85_v41 = vmul.f32 %v137_v38, %v82_v40 }
 0x21b   :  { %v86_v42 = vmul.f32 1.442695, %v85_v41 }
 0x21d   :  { %140 = vpow2.f32 %v86_v42 }
 0x22a   :  { %v141_v43 = vpop.eup %140 }
 0x22b   :  { %89 = vst.msk [vmem:[%s276_s2] sm:$0xff] %vm88_vm2, %v141_v43 }
 0x22c PF:  { %p90_p8 = por %p31_p7, %p30_p6 }
 0x22e   :  { %p91_p9 = por %p90_p8, %p29_p5 }
 0x230   :  { %94 = sbr.rel (%p91_p9) target bundleno = 777 (0x309), region = 29 }
 0x235   :  { %142 = vlog2.f32 %v206_v2  ;;  %v99_v45 = vstv %s274_s0  ;;  %vm116_vm3 = vcmask 7168  }
 0x236   :  { %144 = vlog2.f32 %v208_v3 }
 0x242   :  { %v143_v44 = vpop.eup %142 }
 0x243   :  { %v145_v46 = vpop.eup %144  ;;  %v96_v47 = vmul.f32 0.6931472, %v143_v44 }
 0x244   :  { %v98_v48 = vmul.f32 0.6931472, %v145_v46 }
 0x245   :  { %v100_v49 = vmul.f32 %v99_v45, %v96_v47 }
 0x246   :  { %v101_v50 = vmul.f32 %v99_v45, %v98_v48 }
 0x247   :  { %v102_v51 = vmul.f32 1.442695, %v100_v49 }
 0x248   :  { %v104_v52 = vmul.f32 1.442695, %v101_v50 }
 0x249   :  { %146 = vpow2.f32 %v102_v51 }
 0x24a   :  { %148 = vpow2.f32 %v104_v52 }
 0x24b   :  { %150 = vrcp.f32 %v99_v45 }
 0x256   :  { %v147_v53 = vpop.eup %146 }
 0x257   :  { %v149_v54 = vpop.eup %148 }
 0x258   :  { %v106_v55 = vadd.f32 %v149_v54, %v147_v53  ;;  %v151_v58 = vpop.eup %150 }
 0x25a   :  { %107 = vadd.xlane.f32.xlu0 %v106_v55 }
 0x2e3   :  { %v108_v56 = vpop.xlane.xlu0 %107 }
 0x2e4   :  { %v109_v57 = vmul.f32 0.00390625, %v108_v56 }
 0x2e6   :  { %152 = vlog2.f32 %v109_v57 }
 0x2f3   :  { %v153_v59 = vpop.eup %152 }
 0x2f4   :  { %v111_v60 = vmul.f32 0.6931472, %v153_v59 }
 0x2f6   :  { %v113_v61 = vmul.f32 %v151_v58, %v111_v60 }
 0x2f8   :  { %v114_v62 = vmul.f32 1.442695, %v113_v61 }
 0x2fa   :  { %154 = vpow2.f32 %v114_v62 }
 0x307   :  { %v155_v63 = vpop.eup %154 }
 0x308   :  { %117 = vst.msk [vmem:[%s276_s2] sm:$0xff] %vm116_vm3, %v155_v63 }
 0x309 PF:  { %122 = vsyncpa [#allocation4], 1 }

</bundles_post_ra>
